<compile_context>
chip_gen: v7x
topology: tpu7x:2x2x1
jax: 0.10.0
libtpu: 0.0.40
codegen_flags: <defaults>
</compile_context>

<pallas_src>
import jax
import jax.numpy as jnp
from jax.experimental import pallas as pl
from jax.experimental.pallas import tpu as pltpu

# ----------------------------- problem sizes -----------------------------
N, C, H, W = 2, 4, 16, 16                  # inputs / targets (NCHW)
B_PTS, D_IN, D_HID, D_OUT = 8, 8, 32, 8    # boundary points and MLP dims
LAM = 0.5                                  # penalty strength (baked in)

TOTAL = N * C * H * W                      # 2048 elements in the fit term
INV_TOTAL = 1.0 / TOTAL                    # compile-time reciprocal
PEN_SCALE = LAM / (B_PTS * D_OUT)          # lam * (1 / num penalty elements)


# ------------------------------- kernel ----------------------------------
def periodic_loss_kernel(x_ref, t_ref, b_ref,
                         w1_ref, bb1_ref, w2_ref, bb2_ref, o_ref):
    # --- data-fit term: mean squared error over the whole tensor ---
    # Upcast in-vreg (no-op for f32 inputs, handles bf16 without a wrapper op).
    diff = x_ref[...].astype(jnp.float32) - t_ref[...].astype(jnp.float32)
    fit = jnp.sum(diff * diff) * INV_TOTAL

    # --- periodic penalty: ONE batched MLP pass over stacked boundaries ---
    # b_ref is (2*B_PTS, D_IN): rows [0, B_PTS) = bdry1, rows [B_PTS, 2*B_PTS) = bdry2.
    h = jnp.tanh(
        jnp.dot(b_ref[...], w1_ref[...], preferred_element_type=jnp.float32)
        + bb1_ref[...]
    )
    y = (jnp.dot(h, w2_ref[...], preferred_element_type=jnp.float32)
         + bb2_ref[...])
    d = y[:B_PTS, :] - y[B_PTS:, :]
    penalty = jnp.sum(d * d) * PEN_SCALE

    o_ref[0, 0] = fit + penalty


# ------------------------------- wrapper ----------------------------------
def periodic_loss(inputs, targets, bdry1, bdry2, w1, b1, w2, b2):
    """inputs/targets: (N, C, H, W); bdry*: (B_PTS, D_IN); MLP params as 2D."""
    total = inputs.size
    # Flatten NCHW to a lane-dense 2D tile (rows, 128). No dtype cast here:
    # the reshape is free/contiguous and the upcast happens in-kernel.
    x2d = inputs.reshape(total // 128, 128)
    t2d = targets.reshape(total // 128, 128)

    # Stack the two boundaries so the kernel runs the MLP once (batched).
    bstack = jnp.concatenate([bdry1, bdry2], axis=0).astype(jnp.float32)

    # Advisory cost estimate so XLA can overlap this tiny custom call.
    flops = (
        3 * total                                    # sub, mul, reduce (fit)
        + 2 * (2 * B_PTS) * D_IN * D_HID             # layer-1 matmul
        + 2 * (2 * B_PTS) * D_HID * D_OUT            # layer-2 matmul
        + 6 * (2 * B_PTS) * D_OUT                    # biases, diff, square, reduce
    )
    bytes_accessed = (
        x2d.size * x2d.dtype.itemsize
        + t2d.size * t2d.dtype.itemsize
        + bstack.size * 4
        + (w1.size + b1.size + w2.size + b2.size) * 4
        + 4
    )

    out = pl.pallas_call(
        periodic_loss_kernel,
        out_shape=jax.ShapeDtypeStruct((1, 1), jnp.float32),
        in_specs=[pl.BlockSpec(memory_space=pltpu.MemorySpace.VMEM)] * 7,
        out_specs=pl.BlockSpec(memory_space=pltpu.MemorySpace.SMEM),
        cost_estimate=pl.CostEstimate(
            flops=flops,
            transcendentals=2 * B_PTS * D_HID,       # tanh on the hidden layer
            bytes_accessed=bytes_accessed,
        ),
    )(x2d, t2d, bstack,
      w1.astype(jnp.float32), b1.reshape(1, -1).astype(jnp.float32),
      w2.astype(jnp.float32), b2.reshape(1, -1).astype(jnp.float32))
    return out[0, 0]


# ------------------------------- reference ---------------------------------
def periodic_loss_ref(inputs, targets, bdry1, bdry2, w1, b1, w2, b2):
    def mlp(x):
        return jnp.tanh(x @ w1 + b1) @ w2 + b2
    fit = jnp.mean((inputs.astype(jnp.float32) - targets.astype(jnp.float32)) ** 2)
    penalty = LAM * jnp.mean((mlp(bdry1) - mlp(bdry2)) ** 2)
    return fit + penalty


# --------------------------------- main -------------------------------------
if __name__ == "__main__":
    key = jax.random.PRNGKey(0)
    k = jax.random.split(key, 8)

    inputs  = jax.random.normal(k[0], (N, C, H, W), dtype=jnp.float32)
    targets = jax.random.normal(k[1], (N, C, H, W), dtype=jnp.float32)
    bdry1   = jax.random.normal(k[2], (B_PTS, D_IN), dtype=jnp.float32)
    bdry2   = jax.random.normal(k[3], (B_PTS, D_IN), dtype=jnp.float32)

    # Deterministic MLP parameters (the module's "model" callable).
    w1 = jax.random.normal(k[4], (D_IN, D_HID), dtype=jnp.float32) * 0.1
    b1 = jax.random.normal(k[5], (D_HID,), dtype=jnp.float32) * 0.1
    w2 = jax.random.normal(k[6], (D_HID, D_OUT), dtype=jnp.float32) * 0.1
    b2 = jax.random.normal(k[7], (D_OUT,), dtype=jnp.float32) * 0.1

    loss = periodic_loss(inputs, targets, bdry1, bdry2, w1, b1, w2, b2)
    jax.block_until_ready(loss)

    ref = periodic_loss_ref(inputs, targets, bdry1, bdry2, w1, b1, w2, b2)
    assert jnp.allclose(loss, ref, rtol=1e-5, atol=1e-5), (loss, ref)

    print("KERNEL_OK")
</pallas_src>

<mosaic_0001>
module attributes {stable_mosaic.version = 11 : i64} {
  func.func @periodic_loss_kernel(%arg0: memref<16x128xf32, #tpu.memory_space<vmem>>, %arg1: memref<16x128xf32, #tpu.memory_space<vmem>>, %arg2: memref<16x8xf32, #tpu.memory_space<vmem>>, %arg3: memref<8x32xf32, #tpu.memory_space<vmem>>, %arg4: memref<1x32xf32, #tpu.memory_space<vmem>>, %arg5: memref<32x8xf32, #tpu.memory_space<vmem>>, %arg6: memref<1x8xf32, #tpu.memory_space<vmem>>, %arg7: memref<1x1xf32, #tpu.memory_space<smem>>) attributes {dimension_semantics = [], scalar_prefetch = 0 : i64, scratch_operands = 0 : i64, tpu.core_type = #tpu.core_type<tc>} {
    %c0 = arith.constant 0 : index
    %c0_0 = arith.constant 0 : index
    %0 = vector.load %arg0[%c0, %c0_0] : memref<16x128xf32, #tpu.memory_space<vmem>>, vector<16x128xf32>
    %c0_1 = arith.constant 0 : index
    %c0_2 = arith.constant 0 : index
    %1 = vector.load %arg1[%c0_1, %c0_2] : memref<16x128xf32, #tpu.memory_space<vmem>>, vector<16x128xf32>
    %2 = arith.subf %0, %1 : vector<16x128xf32>
    %3 = arith.mulf %2, %2 : vector<16x128xf32>
    %4 = vector.shape_cast %3 : vector<16x128xf32> to vector<1x16x128xf32>
    %cst = arith.constant dense<0.000000e+00> : vector<1xf32>
    %5 = vector.multi_reduction <add>, %4, %cst [1, 2] : vector<1x16x128xf32> to vector<1xf32>
    %6 = vector.shape_cast %5 : vector<1xf32> to vector<1x1x1xf32>
    %7 = vector.extract %6[0, 0, 0] : f32 from vector<1x1x1xf32>
    %cst_3 = arith.constant 4.8828125E-4 : f32
    %8 = arith.mulf %7, %cst_3 : f32
    %c0_4 = arith.constant 0 : index
    %c0_5 = arith.constant 0 : index
    %9 = vector.load %arg2[%c0_4, %c0_5] : memref<16x8xf32, #tpu.memory_space<vmem>>, vector<16x8xf32>
    %c0_6 = arith.constant 0 : index
    %c0_7 = arith.constant 0 : index
    %10 = vector.load %arg3[%c0_6, %c0_7] : memref<8x32xf32, #tpu.memory_space<vmem>>, vector<8x32xf32>
    %cst_8 = arith.constant dense<0.000000e+00> : vector<16x32xf32>
    %11 = tpu.matmul %9, %10, %cst_8 {dimension_numbers = #tpu.dot_dimension_numbers<[1], [0], [0], [1], [0, 0, 1, 1], [], []>} : vector<16x8xf32>, vector<8x32xf32>, vector<16x32xf32> -> vector<16x32xf32>
    %c0_9 = arith.constant 0 : index
    %c0_10 = arith.constant 0 : index
    %12 = vector.load %arg4[%c0_9, %c0_10] : memref<1x32xf32, #tpu.memory_space<vmem>>, vector<1x32xf32>
    %13 = vector.broadcast %12 : vector<1x32xf32> to vector<16x32xf32>
    %14 = arith.addf %11, %13 : vector<16x32xf32>
    %15 = math.tanh %14 : vector<16x32xf32>
    %c0_11 = arith.constant 0 : index
    %c0_12 = arith.constant 0 : index
    %16 = vector.load %arg5[%c0_11, %c0_12] : memref<32x8xf32, #tpu.memory_space<vmem>>, vector<32x8xf32>
    %cst_13 = arith.constant dense<0.000000e+00> : vector<16x8xf32>
    %17 = tpu.matmul %15, %16, %cst_13 {dimension_numbers = #tpu.dot_dimension_numbers<[1], [0], [0], [1], [0, 0, 1, 1], [], []>} : vector<16x32xf32>, vector<32x8xf32>, vector<16x8xf32> -> vector<16x8xf32>
    %c0_14 = arith.constant 0 : index
    %c0_15 = arith.constant 0 : index
    %18 = vector.load %arg6[%c0_14, %c0_15] : memref<1x8xf32, #tpu.memory_space<vmem>>, vector<1x8xf32>
    %19 = vector.broadcast %18 : vector<1x8xf32> to vector<16x8xf32>
    %20 = arith.addf %17, %19 : vector<16x8xf32>
    %21 = vector.extract_strided_slice %20 {offsets = [0, 0], sizes = [8, 8], strides = [1, 1]} : vector<16x8xf32> to vector<8x8xf32>
    %22 = vector.extract_strided_slice %20 {offsets = [8, 0], sizes = [8, 8], strides = [1, 1]} : vector<16x8xf32> to vector<8x8xf32>
    %23 = arith.subf %21, %22 : vector<8x8xf32>
    %24 = arith.mulf %23, %23 : vector<8x8xf32>
    %25 = vector.shape_cast %24 : vector<8x8xf32> to vector<1x8x8xf32>
    %cst_16 = arith.constant dense<0.000000e+00> : vector<1xf32>
    %26 = vector.multi_reduction <add>, %25, %cst_16 [1, 2] : vector<1x8x8xf32> to vector<1xf32>
    %27 = vector.shape_cast %26 : vector<1xf32> to vector<1x1x1xf32>
    %28 = vector.extract %27[0, 0, 0] : f32 from vector<1x1x1xf32>
    %cst_17 = arith.constant 7.812500e-03 : f32
    %29 = arith.mulf %28, %cst_17 : f32
    %30 = arith.addf %8, %29 : f32
    %c0_18 = arith.constant 0 : index
    %c0_19 = arith.constant 0 : index
    %31 = memref.load %arg7[%c0_18, %c0_19] : memref<1x1xf32, #tpu.memory_space<smem>>
    memref.store %30, %arg7[%c0_18, %c0_19] : memref<1x1xf32, #tpu.memory_space<smem>>
    return
  }
}

</mosaic_0001>

<bundles_post_ra>
// kernel: tpu_custom_call.1
= control target key start
LH: loop header
LB: loop body
LE: loop exit
PB: predicated region body
PF: predicated region fallthrough
CT: control target
= control target key end

     0   :  { %vm56_vm0 = vcmask 64512   ;;  %s417_s0 = inlined_call_operand.vmem [shape: f32[16,128], index: 0, kind: input, shape index: {}]   ;;  %s418_s1 = inlined_call_operand.vmem [shape: f32[16,128], index: 1, kind: input, shape index: {}]   ;;  %s419_s2 = inlined_call_operand.vmem [shape: f32[16,8], index: 2, kind: input, shape index: {}]   ;;  %s420_s3 = inlined_call_operand.vmem [shape: f32[8,32], index: 3, kind: input, shape index: {}]   ;;  %s421_s4 = inlined_call_operand.vmem [shape: f32[1,32], index: 4, kind: input, shape index: {}]   ;;  %s422_s5 = inlined_call_operand.vmem [shape: f32[32,8], index: 5, kind: input, shape index: {}]   ;;  %s423_s6 = inlined_call_operand.vmem [shape: f32[1,8], index: 6, kind: input, shape index: {}]   ;;  %s424_s7 = inlined_call_operand.hbm [shape: f32[1,1], index: 7, kind: output, shape index: {}]  }
   0x1   :  { %v48_v0 = vld [vmem:[%s420_s3] sm:$0xff]  ;;  %v47_v2 = vld [vmem:[%s419_s2 + $0x8] sm:$0xff] }
   0x2   :  { %v46_v1 = vld [vmem:[%s419_s2] sm:$0xff]  ;;  %277 = vmatprep.subr.mxu0 %v48_v0 }
   0x3   :  { %279 = vmatprep.mubr.msk.f32.mxu0 %vm56_vm0, %v46_v1 }
   0x4   :  { %12 = vsyncpa [#allocation3], 0  ;;  %278 = vmatpush3.msra.mxu0 %v48_v0  ;;  %v140_v3 = vld [vmem:[%s422_s5] sm:$0xff]  ;;  %v141_v4 = vld [vmem:[%s422_s5 + $0x8] sm:$0xff]  ;;  %vm151_vm1 = vcmask 261120   ;;  %s310_s27 = scalar_lea.hbm %s424_s7, 16 }
   0x5   :  { %280 = vmatmul.mubr.msk.f32.vlgmr.msra.gmra.mrb[0].mxu0 %vm56_vm0, %v47_v2  ;;  %v142_v5 = vld [vmem:[%s422_s5 + $0x10] sm:$0xff]  ;;  %v293_v6 = vpack.c.bf16 %v141_v4, %v140_v3  ;;  %v143_v7 = vld [vmem:[%s422_s5 + $0x18] sm:$0xff]  ;;  %v27_v9 = vld [vmem:[%s417_s0] sm:$0xff]  ;;  %p311_p0 = scmp.ne.s32.totalorder %s424_s7, %s310_s27  ;;  %p314_p1 = scmp.lt.u32.totalorder %s310_s27, %s424_s7 }
   0x6   :  { %v297_v8 = vpack.c.bf16 %v143_v7, %v142_v5  ;;  %v28_v10 = vld [vmem:[%s417_s0 + $0x8] sm:$0xff]  ;;  %v29_v11 = vld [vmem:[%s418_s1] sm:$0xff] }
   0x7   :  { %294 = vmatprep.subr.bf16.mxu1 %v293_v6  ;;  %v30_v12 = vld [vmem:[%s418_s1 + $0x8] sm:$0xff]  ;;  %v31_v13 = vsub.f32 %v27_v9, %v29_v11  ;;  %v262_v18 = vld [vmem:[%s421_s4] ss:$0 sm:$0xff]  ;;  %p316_p2 = pnand %p314_p1, %p311_p0 }
   0x8   :  { %296 = vmatpush3.bf16.msra.mxu1 %v293_v6  ;;  %v32_v14 = vsub.f32 %v28_v10, %v30_v12  ;;  %v265_v25 = vld [vmem:[%s423_s6] ss:$0 sm:$0xff] }
   0x9   :  { %298 = vmatprep.subr.bf16.mxu1 %v297_v8  ;;  %v33_v15 = vmul.f32 %v31_v13, %v31_v13 }
   0xa   :  { %v34_v16 = vmul.f32 %v32_v14, %v32_v14 }
   0xc   :  { %300 = vmatpush3.bf16.msra.mxu1 %v297_v8  ;;  %v35_v17 = vadd.f32 %v34_v16, %v33_v15 }
   0xe   :  { %36 = vadd.xlane.f32.xlu0 %v35_v17 }
  0x9b   :  { %v37_v31 = vpop.xlane.xlu0 %36 }
  0x9c   :  { %v38_v33 = vrot.slane %v37_v31, 4 }
  0x9e   :  { %v39_v35 = vadd.f32 %v38_v33, %v37_v31 }
  0xa0   :  { %v40_v36 = vrot.slane %v39_v35, 2 }
  0xa2   :  { %v41_v37 = vadd.f32 %v40_v36, %v39_v35 }
  0xa4   :  { %v42_v38 = vrot.slane %v41_v37, 1 }
  0xa6   :  { %v43_v39 = vadd.f32 %v42_v38, %v41_v37 }
  0xa8   :  { %301 = vpush %v43_v39 }
  0xd8   :  { %v281_v19 = vpop.f32.mrb[0].mxu0 }
  0xd9   :  { %v135_v20 = vadd.f32 %v281_v19, %v262_v18  ;;  %v129_v21 = vpop.f32.mrb[1].mxu0  ;;  %s302_s4 = spop %301 }
  0xda   :  { %v130_v22 = vadd.f32 %v262_v18, %v129_v21  ;;  %s45_s6 = smul.f32 0.00048828125, %s302_s4 }
  0xdc   :  { %306 = vtanh.f32 %v130_v22 }
  0xdd   :  { %308 = vtanh.f32 %v135_v20 }
  0xe6   :  { %v307_v23 = vpop.eup %306 }
  0xe7   :  { %v309_v24 = vpop.eup %308  ;;  %290 = vmatprep.mubr.msk.f32.mxu1 %vm151_vm1, %v307_v23 }
  0xe8   :  { %291 = vmatmul.mubr.msk.f32.vlgmr.msra.gmra.mrb[0].mxu1 %vm151_vm1, %v309_v24 }
 0x1bb   :  { %v292_v26 = vpop.f32.mrb[0].mxu1 }
 0x1bc   :  { %v230_v27 = vadd.f32 %v292_v26, %v265_v25  ;;  %v224_v28 = vpop.f32.mrb[1].mxu1 }
 0x1bd   :  { %v225_v29 = vadd.f32 %v265_v25, %v224_v28 }
 0x1bf   :  { %v233_v30 = vsub.f32 %v225_v29, %v230_v27 }
 0x1c1   :  { %v234_v32 = vmul.f32 %v233_v30, %v233_v30 }
 0x1c3   :  { %v235_v34 = vsel %vm56_vm0, %v234_v32, 0.0 }
 0x1c4   :  { %236 = vadd.xlane.f32.xlu0 %v235_v34 }
 0x251   :  { %v237_v40 = vpop.xlane.xlu0 %236 }
 0x252   :  { %v238_v41 = vrot.slane %v237_v40, 4 }
 0x254   :  { %v239_v42 = vadd.f32 %v238_v41, %v237_v40 }
 0x256   :  { %v240_v43 = vrot.slane %v239_v42, 2 }
 0x258   :  { %v241_v44 = vadd.f32 %v240_v43, %v239_v42 }
 0x25a   :  { %v242_v45 = vrot.slane %v241_v44, 1 }
 0x25c   :  { %v243_v46 = vadd.f32 %v242_v45, %v241_v44 }
 0x25e   :  { %303 = vpush %v243_v46 }
 0x28f   :  { %s304_s22 = spop %303 }
 0x290   :  { %s245_s23 = smul.f32 0.0078125, %s304_s22 }
 0x292   :  { %s246_s24 = sadd.f32 %s245_s23, %s45_s6 }
 0x294   :  { %248 = sst [smem:[#allocation2]] %s246_s24 }
 0x295   :  { %319 = shalt.err (!%p316_p2)
}
 0x296   :  { %s322_s3 = smov [#allocation2]  }
 0x297   :  { %256 = dma.smem_to_hbm %s322_s3, 16, %s424_s7, [#allocation3]  }
 0x298   :  { %320 = dma.done.wait [#allocation3], 16  }
 0x299   :  { %321 = vsyncadd [#allocation3], 4294967280 }
 0x29a   :  { %260 = sfence }
 0x29b   :  { %261 = vsyncpa [#allocation3], 1 }

</bundles_post_ra>
